<compile_context>
chip_gen: v7x
topology: tpu7x:2x2x1
jax: 0.10.0
libtpu: 0.0.40
codegen_flags: <defaults>
</compile_context>

<pallas_src>
import jax
import jax.numpy as jnp
from jax.experimental import pallas as pl
from jax.experimental.pallas import tpu as pltpu

D_FEAT = 64                 # nn.Linear(64, 64)
PACK = 2                    # pack 2 rows of 64 features -> one 128-lane row
D_PACKED = PACK * D_FEAT    # 128
_MAX_TP = 8192              # max packed rows per block (~4 MiB f32); safe on v5e/v6e/v7x


def mlp_kernel(x_ref, w_ref, b_ref, o_ref):
    # Fused ReLU -> matmul (MXU, f32 accumulate) -> bias add, all in VMEM.
    x = jnp.maximum(x_ref[...], 0.0)                       # ReLU(inplace=True)
    y = jnp.dot(x, w_ref[...], preferred_element_type=jnp.float32)
    o_ref[...] = (y + b_ref[...]).astype(o_ref.dtype)


def prepare_params(w, b):
    """One-time parameter prep.

    w: (64, 64) in PyTorch (out_features, in_features) layout, b: (64,).
    Returns:
      w_packed: (128, 128) block-diagonal diag(W^T, W^T)
      b_packed: (1, 128) = [b | b]
    so the kernel operates on lane-dense 128-wide packed rows while computing
    exactly relu(x) @ W^T + b per original row (off-diagonal blocks are zero).
    """
    wt = w.T.astype(jnp.float32)  # (in, out)
    w_packed = jnp.zeros((D_PACKED, D_PACKED), jnp.float32)
    w_packed = w_packed.at[:D_FEAT, :D_FEAT].set(wt)
    w_packed = w_packed.at[D_FEAT:, D_FEAT:].set(wt)
    b_packed = jnp.tile(b.astype(jnp.float32).reshape(1, D_FEAT), (1, PACK))
    return w_packed, b_packed


def _pick_tile(rows, tp_target):
    """Fixed tile size (multiple of 8, <= _MAX_TP); never falls back to tp=rows.

    Also clamps to ceil(rows/2) so the grid has >= 2 steps whenever rows allow,
    keeping double-buffered pipelining and v7x two-TensorCore sharding alive.
    """
    tp_target = max(8, min(int(tp_target), _MAX_TP))
    if rows <= 8:
        return rows                       # block == full array extent (allowed)
    tp = min(tp_target, (rows + 1) // 2)  # >= 2 grid steps
    return max(8, (tp // 8) * 8)


def _mlp_call(rows, tp, dtype, flops, bytes_accessed, vmem_limit,
              weight_single_buffered):
    if weight_single_buffered:
        # Constant index maps -> no second buffer needed for W / b.
        w_spec = pl.BlockSpec((D_PACKED, D_PACKED), lambda i: (0, 0),
                              pipeline_mode=pl.Buffered(1))
        b_spec = pl.BlockSpec((1, D_PACKED), lambda i: (0, 0),
                              pipeline_mode=pl.Buffered(1))
    else:
        w_spec = pl.BlockSpec((D_PACKED, D_PACKED), lambda i: (0, 0))
        b_spec = pl.BlockSpec((1, D_PACKED), lambda i: (0, 0))

    return pl.pallas_call(
        mlp_kernel,
        out_shape=jax.ShapeDtypeStruct((rows, D_PACKED), dtype),
        grid=(pl.cdiv(rows, tp),),                         # ragged last block OK
        in_specs=[
            pl.BlockSpec((tp, D_PACKED), lambda i: (i, 0)),  # batch-tiled x
            w_spec,                                          # resident W
            b_spec,                                          # resident b
        ],
        out_specs=pl.BlockSpec((tp, D_PACKED), lambda i: (i, 0)),
        compiler_params=pltpu.CompilerParams(
            dimension_semantics=("parallel",),   # megacore sharding on v7x
            vmem_limit_bytes=vmem_limit,
        ),
        cost_estimate=pl.CostEstimate(
            flops=flops, transcendentals=0, bytes_accessed=bytes_accessed),
    )


def mlp_forward(x, w_packed, b_packed, *, tile_rows=PACK * _MAX_TP):
    """x: (B, 64) f32 -> (B, 64) f32, computing relu(x) @ W^T + b.

    tile_rows: target number of *original* batch rows per grid step.  Default
    (16384 rows -> 8192 packed rows) gives 4 MiB in + 4 MiB out per step; the
    wrapper clamps it so the grid always has multiple steps when possible.
    """
    B, d_in = x.shape
    assert d_in == D_FEAT, f"expected {D_FEAT} input features, got {d_in}"

    if B % PACK:
        # TODO(synk): for production arrange an even batch upstream; this single
        # trailing-row pad still materializes one HBM copy of x for odd B.
        x = jnp.pad(x, ((0, 1), (0, 0)))
    rows = x.shape[0] // PACK
    # Free row-major reshape: 2 consecutive 64-feature rows -> one 128-lane row.
    xp = x.reshape(rows, D_PACKED)

    tp = _pick_tile(rows, tile_rows // PACK)

    itemsize = jnp.dtype(x.dtype).itemsize
    # Real work only (zero off-diagonal blocks of the packed weight not counted).
    flops = 2 * B * D_FEAT * D_FEAT + B * D_FEAT
    bytes_accessed = (itemsize * 2 * B * D_FEAT
                      + 4 * (D_PACKED * D_PACKED + D_PACKED))
    # 2x(in block) + 2x(out block) + params (worst-case double-buffered) + headroom.
    vmem_limit = int(4 * tp * D_PACKED * itemsize
                     + 2 * (D_PACKED * D_PACKED + D_PACKED) * 4
                     + (4 << 20))

    args = (rows, tp, x.dtype, flops, bytes_accessed, vmem_limit)
    try:
        out_p = _mlp_call(*args, weight_single_buffered=True)(xp, w_packed, b_packed)
    except Exception:
        # pipeline_mode=pl.Buffered(1) not supported on this jax version: the
        # only cost is a redundant 64 KiB weight double-buffer.
        out_p = _mlp_call(*args, weight_single_buffered=False)(xp, w_packed, b_packed)

    out = out_p.reshape(rows * PACK, D_FEAT)  # free row-major reshape back
    return out if out.shape[0] == B else out[:B]


if __name__ == "__main__":
    key = jax.random.PRNGKey(0)
    k_x, k_x2, k_w, k_b = jax.random.split(key, 4)

    B, D = 512, 64

    x = jax.random.normal(k_x, (B, D), dtype=jnp.float32)
    # Deterministic params mimicking PyTorch Linear's uniform(+-1/sqrt(fan_in)).
    bound = 1.0 / jnp.sqrt(jnp.float32(D))
    w = jax.random.uniform(k_w, (D, D), minval=-bound, maxval=bound,
                           dtype=jnp.float32)   # (out, in) PyTorch layout
    b = jax.random.uniform(k_b, (D,), minval=-bound, maxval=bound,
                           dtype=jnp.float32)

    w_packed, b_packed = prepare_params(w, b)   # one-time param prep

    def ref_fn(xx):  # plain-JAX reference == the PyTorch module's forward
        return jnp.maximum(xx, 0.0) @ w.T + b[None, :]

    # Even batch: default tile clamps to rows/2 -> grid=(2,) (pipelined).
    out = mlp_forward(x, w_packed, b_packed)
    jax.block_until_ready(out)
    assert out.shape == (B, D)
    assert jnp.allclose(out, ref_fn(x), atol=1e-4, rtol=1e-4), "mismatch vs reference"

    # Odd / awkward batch: exercises the one-row pad and the cdiv ragged last block.
    B2 = 137
    x2 = jax.random.normal(k_x2, (B2, D), dtype=jnp.float32)
    out2 = mlp_forward(x2, w_packed, b_packed)
    jax.block_until_ready(out2)
    assert out2.shape == (B2, D)
    assert jnp.allclose(out2, ref_fn(x2), atol=1e-4, rtol=1e-4), "mismatch vs reference (odd B)"

    print("KERNEL_OK")
</pallas_src>

<mosaic_0001>
module attributes {stable_mosaic.version = 11 : i64} {
  func.func @mlp_kernel(%arg0: i32, %arg1: memref<128x128xf32, #tpu.memory_space<vmem>>, %arg2: memref<128x128xf32, #tpu.memory_space<vmem>>, %arg3: memref<1x128xf32, #tpu.memory_space<vmem>>, %arg4: memref<128x128xf32, #tpu.memory_space<vmem>>) attributes {dimension_semantics = [#tpu.dimension_semantics<parallel>], iteration_bounds = array<i64: 2>, scalar_prefetch = 0 : i64, scratch_operands = 0 : i64, tpu.core_type = #tpu.core_type<tc>, window_params = [{transform_indices = @transform_0, window_bounds = array<i64: 128, 128>}, {pipeline_mode = #tpu.pipeline_mode<synchronous>, transform_indices = @transform_1, window_bounds = array<i64: 128, 128>}, {pipeline_mode = #tpu.pipeline_mode<synchronous>, transform_indices = @transform_2, window_bounds = array<i64: 1, 128>}, {transform_indices = @transform_3, window_bounds = array<i64: 128, 128>}]} {
    %c0 = arith.constant 0 : index
    %c0_0 = arith.constant 0 : index
    %0 = vector.load %arg1[%c0, %c0_0] : memref<128x128xf32, #tpu.memory_space<vmem>>, vector<128x128xf32>
    %cst = arith.constant 0.000000e+00 : f32
    %1 = vector.broadcast %cst : f32 to vector<128x128xf32>
    %2 = arith.maximumf %0, %1 : vector<128x128xf32>
    %c0_1 = arith.constant 0 : index
    %c0_2 = arith.constant 0 : index
    %3 = vector.load %arg2[%c0_1, %c0_2] : memref<128x128xf32, #tpu.memory_space<vmem>>, vector<128x128xf32>
    %cst_3 = arith.constant dense<0.000000e+00> : vector<128x128xf32>
    %4 = tpu.matmul %2, %3, %cst_3 {dimension_numbers = #tpu.dot_dimension_numbers<[1], [0], [0], [1], [0, 0, 1, 1], [], []>} : vector<128x128xf32>, vector<128x128xf32>, vector<128x128xf32> -> vector<128x128xf32>
    %c0_4 = arith.constant 0 : index
    %c0_5 = arith.constant 0 : index
    %5 = vector.load %arg3[%c0_4, %c0_5] : memref<1x128xf32, #tpu.memory_space<vmem>>, vector<1x128xf32>
    %6 = vector.broadcast %5 : vector<1x128xf32> to vector<128x128xf32>
    %7 = arith.addf %4, %6 : vector<128x128xf32>
    %c0_6 = arith.constant 0 : index
    %c0_7 = arith.constant 0 : index
    %8 = vector.load %arg4[%c0_6, %c0_7] : memref<128x128xf32, #tpu.memory_space<vmem>>, vector<128x128xf32>
    tpu.vector_store %arg4[%c0_6, %c0_7], %7 {strides = array<i32>} : memref<128x128xf32, #tpu.memory_space<vmem>>, vector<128x128xf32>,
    return
  }
  func.func @transform_0(%arg0: i32) -> (i32, i32) {
    %c0_i32 = arith.constant 0 : i32
    %c0_i32_0 = arith.constant 0 : i32
    return %arg0, %c0_i32 : i32, i32
  }
  func.func @transform_1(%arg0: i32) -> (i32, i32) {
    %c0_i32 = arith.constant 0 : i32
    %c0_i32_0 = arith.constant 0 : i32
    %c0_i32_1 = arith.constant 0 : i32
    return %c0_i32, %c0_i32_0 : i32, i32
  }
  func.func @transform_2(%arg0: i32) -> (i32, i32) {
    %c0_i32 = arith.constant 0 : i32
    %c0_i32_0 = arith.constant 0 : i32
    %c0_i32_1 = arith.constant 0 : i32
    return %c0_i32, %c0_i32_0 : i32, i32
  }
  func.func @transform_3(%arg0: i32) -> (i32, i32) {
    %c0_i32 = arith.constant 0 : i32
    %c0_i32_0 = arith.constant 0 : i32
    return %arg0, %c0_i32 : i32, i32
  }
}

module attributes {stable_mosaic.version = 11 : i64} {
  func.func @mlp_kernel(%arg0: i32, %arg1: memref<128x128xf32, #tpu.memory_space<vmem>>, %arg2: memref<128x128xf32, #tpu.memory_space<vmem>>, %arg3: memref<1x128xf32, #tpu.memory_space<vmem>>, %arg4: memref<128x128xf32, #tpu.memory_space<vmem>>) attributes {dimension_semantics = [#tpu.dimension_semantics<parallel>], iteration_bounds = array<i64: 2>, scalar_prefetch = 0 : i64, scratch_operands = 0 : i64, tpu.core_type = #tpu.core_type<tc>, window_params = [{transform_indices = @transform_0, window_bounds = array<i64: 128, 128>}, {pipeline_mode = #tpu.pipeline_mode<synchronous>, transform_indices = @transform_1, window_bounds = array<i64: 128, 128>}, {pipeline_mode = #tpu.pipeline_mode<synchronous>, transform_indices = @transform_2, window_bounds = array<i64: 1, 128>}, {transform_indices = @transform_3, window_bounds = array<i64: 128, 128>}]} {
    %c0 = arith.constant 0 : index
    %c0_0 = arith.constant 0 : index
    %0 = vector.load %arg1[%c0, %c0_0] : memref<128x128xf32, #tpu.memory_space<vmem>>, vector<128x128xf32>
    %cst = arith.constant 0.000000e+00 : f32
    %1 = vector.broadcast %cst : f32 to vector<128x128xf32>
    %2 = arith.maximumf %0, %1 : vector<128x128xf32>
    %c0_1 = arith.constant 0 : index
    %c0_2 = arith.constant 0 : index
    %3 = vector.load %arg2[%c0_1, %c0_2] : memref<128x128xf32, #tpu.memory_space<vmem>>, vector<128x128xf32>
    %cst_3 = arith.constant dense<0.000000e+00> : vector<128x128xf32>
    %4 = tpu.matmul %2, %3, %cst_3 {dimension_numbers = #tpu.dot_dimension_numbers<[1], [0], [0], [1], [0, 0, 1, 1], [], []>} : vector<128x128xf32>, vector<128x128xf32>, vector<128x128xf32> -> vector<128x128xf32>
    %c0_4 = arith.constant 0 : index
    %c0_5 = arith.constant 0 : index
    %5 = vector.load %arg3[%c0_4, %c0_5] : memref<1x128xf32, #tpu.memory_space<vmem>>, vector<1x128xf32>
    %6 = vector.broadcast %5 : vector<1x128xf32> to vector<128x128xf32>
    %7 = arith.addf %4, %6 : vector<128x128xf32>
    %c0_6 = arith.constant 0 : index
    %c0_7 = arith.constant 0 : index
    %8 = vector.load %arg4[%c0_6, %c0_7] : memref<128x128xf32, #tpu.memory_space<vmem>>, vector<128x128xf32>
    tpu.vector_store %arg4[%c0_6, %c0_7], %7 {strides = array<i32>} : memref<128x128xf32, #tpu.memory_space<vmem>>, vector<128x128xf32>,
    return
  }
  func.func @transform_0(%arg0: i32) -> (i32, i32) {
    %c0_i32 = arith.constant 0 : i32
    %c0_i32_0 = arith.constant 0 : i32
    return %arg0, %c0_i32 : i32, i32
  }
  func.func @transform_1(%arg0: i32) -> (i32, i32) {
    %c0_i32 = arith.constant 0 : i32
    %c0_i32_0 = arith.constant 0 : i32
    %c0_i32_1 = arith.constant 0 : i32
    return %c0_i32, %c0_i32_0 : i32, i32
  }
  func.func @transform_2(%arg0: i32) -> (i32, i32) {
    %c0_i32 = arith.constant 0 : i32
    %c0_i32_0 = arith.constant 0 : i32
    %c0_i32_1 = arith.constant 0 : i32
    return %c0_i32, %c0_i32_0 : i32, i32
  }
  func.func @transform_3(%arg0: i32) -> (i32, i32) {
    %c0_i32 = arith.constant 0 : i32
    %c0_i32_0 = arith.constant 0 : i32
    return %arg0, %c0_i32 : i32, i32
  }
}

</mosaic_0001>

<bundles_post_ra>
// kernel: tpu_custom_call.1
= control target key start
LH: loop header
LB: loop body
LE: loop exit
PB: predicated region body
PF: predicated region fallthrough
CT: control target
= control target key end

     0   :  { %8 = vsyncpa [#allocation3], 0  ;;  %s1143_s0 = inlined_call_operand.hbm [shape: f32[256,128], index: 0, kind: input, shape index: {}]   ;;  %s1144_s1 = inlined_call_operand.hbm [shape: f32[128,128], index: 1, kind: input, shape index: {}]   ;;  %s1145_s2 = inlined_call_operand.vmem [shape: f32[1,128], index: 2, kind: input, shape index: {}]   ;;  %s1146_s3 = inlined_call_operand.hbm [shape: f32[256,128], index: 3, kind: output, shape index: {}]  }
   0x1   :  { %10 = vsyncpa [#allocation3 + $0x1], 0 }
   0x2   :  { %11 = vsyncpa [#allocation6], 0 }
   0x3   :  { %12 = vsyncpa [#allocation4], 0 }
   0x4   :  { %14 = vsyncpa [#allocation4 + $0x1], 0  ;;  %s892_s12 = smov 0   ;;  %s894_s13 = smov 0  }
   0x5   :  { %s896_s14 = smov 0   ;;  %s898_s15 = smov 0  }
   0x6 LB: > { %s913_s16 = sadd.s32 4294967295, %s863_s15   ;;  %s519_s17 = sadd.s32 4294967294, %s863_s15   ;;  %s863_s15 = sphi %s898_s15, %s1166_s15   ;;  %s859_s14 = sphi %s896_s14, %s1165_s14   ;;  %s855_s13 = sphi %s894_s13, %s1164_s13   ;;  %s851_s12 = sphi %s892_s12, %s1163_s12  }
   0x7   : > { %p40_p0 = scmp.ne.s32.totalorder %s855_s13, %s851_s12  ;;  %p1147_p1 = scmp.eq.s32.totalorder %s913_s16, 0 }
   0x8   : > { %p112_p3 = scmp.eq.s32.totalorder %s519_s17, 1  ;;  %p520_p5 = scmp.ge.s32.totalorder %s863_s15, 1 }
   0x9   : > { %p922_p4 = por %p1147_p1, %p40_p0  ;;  %p119_p7 = scmp.lt.s32.totalorder %s863_s15, 3 }
   0xa   : > { %p927_p6 = por %p112_p3, %p40_p0  ;;  %s865_s21 = smov [#allocation5]  }
   0xb   : > { %s1150_s18 = scalar_select %p922_p4, 1, 0 }
   0xc   : > { %s1151_s19 = scalar_select %p927_p6, 1, 0 }
   0xd   : > { %p932_p8 = pnand %p520_p5, %p119_p7  ;;  %s131_s22 = sshll.u32 %s865_s21, 4  ;;  %s936_s22 = int_to_ptr.vmem [resolvable:$true] %s131_s22 }
   0xe   : > { %s948_s24 = sadd.s32 1, %s863_s15   ;;  %s27_s25 = sadd.s32 1, %s859_s14 }
   0xf   : > { %s1152_s20 = scalar_select %p932_p8, 1, 0 }
  0x10   : > { %p682_p9 = pneg %p932_p8  ;;  %s24_s26 = ssub.s32 %s863_s15, %s948_s24 }
  0x11   : > { %s735_s29 = scalar_lea.hbm %s1144_s1, 2048 }
  0x12   : > { %p943_p11 = pnand %p682_p9, %p1147_p1  ;;  %p736_p12 = scmp.ne.s32.totalorder %s1144_s1, %s735_s29 }
  0x13   : > { %p742_p5 = scmp.lt.u32.totalorder %s735_s29, %s1144_s1 }
  0x14   : > { %p737_p13 = pneg %p943_p11 }
  0x16   : > { %p738_p0 = pnand %p737_p13, %p736_p12 }
  0x18   : > { %p739_p3 = pneg %p738_p0 }
  0x1a   : > { %p744_p7 = pnand %p742_p5, %p739_p3 }
  0x1c   : > { %747 = shalt.err (!%p744_p7)
}
  0x1d   : > { %s748_s7 = scalar_lea.vmem %s936_s22, 2048  ;;  %p756_p2 = scmp.lt.s32.totalorder %s936_s22, %s936_s22 }
  0x1e   : > { %p749_p9 = scmp.ne.s32.totalorder %s936_s22, %s748_s7  ;;  %p757_p6 = scmp.lt.s32.totalorder %s748_s7, %s748_s7 }
  0x20   : > { %p751_p10 = pnand %p749_p9, %p737_p13  ;;  %p758_p4 = por %p757_p6, %p756_p2 }
  0x22   : > { %p752_p1 = pneg %p751_p10 }
  0x24   : > { %p759_p8 = pnand %p758_p4, %p752_p1 }
  0x26   : > { %762 = shalt.err (!%p759_p8)
}
  0x27   : > { %s866_s8 = smov 128   ;;  %s867_s9 = smov 8  }
  0x28   : > { %685 = dma.hbm_to_vmem [thread:$0]  (!%p943_p11), %s1144_s1, 2048, %s936_s22, [#allocation6], %s866_s8, %s866_s8, %s867_s9  }
  0x29   : > { %p25_p1 = scmp.eq.s32.totalorder %s24_s26, 0  ;;  %p34_p2 = scmp.ne.s32.totalorder %s859_s14, %s855_s13 }
  0x2a   : > { %p35_p4 = scmp.eq.s32.totalorder %s863_s15, 0  ;;  %p695_p6 = scmp.lt.s32.totalorder %s863_s15, 2 }
  0x2b   : > { %s982_s17 = scalar_select %p25_p1, %s859_s14, %s27_s25  }
  0x2c   : > { %p36_p8 = por %p35_p4, %p34_p2  ;;  %p1154_p10 = scmp.eq.s32.totalorder %s913_s16, 1 }
  0x2d   : > { %s148_s23 = sand.u32 1, %s859_s14   ;;  %s536_s27 = sshll.u32 %s863_s15, 11 }
  0x2e   : > { %p986_p12 = por %p1154_p10, %p34_p2  ;;  %s523_s28 = sshll.u32 %s148_s23, 7 }
  0x2f   : > { %s995_s4 = scalar_lea.hbm %s1143_s0, %s536_s27  ;;  %s152_s22 = scalar_lea.vmem [#allocation2], %s523_s28 }
  0x30   : > { %s159_s25 = sshll.u32 %s152_s22, 4  ;;  %p997_p11 = pnand %p695_p6, %p36_p8  ;;  %s1001_s25 = int_to_ptr.vmem [resolvable:$true] %s159_s25 }
  0x31   : > { %s1003_s5 = scalar_lea.sflag [#allocation3], %s148_s23  ;;  %s763_s6 = scalar_lea.hbm %s995_s4, 2048 }
  0x32   : > { %p764_p13 = scmp.ne.s32.totalorder %s995_s4, %s763_s6  ;;  %p765_p0 = pneg %p997_p11 }
  0x33   : > { %s768_s11 = scalar_lea.hbm %s1143_s0, 4096  ;;  %p769_p7 = scmp.lt.u32.totalorder %s995_s4, %s1143_s0 }
  0x34   : > { %p766_p3 = pnand %p765_p0, %p764_p13  ;;  %p770_p9 = scmp.lt.u32.totalorder %s768_s11, %s763_s6 }
  0x35   : > { %p772_p2 = scmp.lt.u32.totalorder %s763_s6, %s995_s4 }
  0x36   : > { %p767_p5 = pneg %p766_p3  ;;  %p771_p1 = por %p770_p9, %p769_p7 }
  0x38   : > { %p773_p4 = por %p772_p2, %p771_p1 }
  0x3a   : > { %p774_p6 = pnand %p773_p4, %p767_p5 }
  0x3c   : > { %777 = shalt.err (!%p774_p6)
}
  0x3d   : > { %s778_s23 = scalar_lea.vmem %s1001_s25, 2048  ;;  %s868_s29 = smov [#allocation2]  }
  0x3e   : > { %p779_p8 = scmp.ne.s32.totalorder %s1001_s25, %s778_s23  ;;  %s783_s30 = sshll.u32 %s868_s29, 4  ;;  %s784_s30 = int_to_ptr.vmem [resolvable:$false] %s783_s30 }
  0x3f   : > { %s785_s22 = scalar_lea.vmem %s784_s30, 4096  ;;  %p786_p3 = scmp.lt.s32.totalorder %s1001_s25, %s784_s30 }
  0x40   : > { %p781_p10 = pnand %p779_p8, %p765_p0  ;;  %p787_p7 = scmp.lt.s32.totalorder %s785_s22, %s778_s23 }
  0x42   : > { %p782_p13 = pneg %p781_p10  ;;  %p788_p9 = por %p787_p7, %p786_p3 }
  0x44   : > { %p789_p1 = pnand %p788_p9, %p782_p13 }
  0x46   : > { %792 = shalt.err (!%p789_p1)
}
  0x47   : > { %689 = dma.hbm_to_vmem [thread:$0]  (!%p997_p11), %s995_s4, 2048, %s1001_s25, %s1003_s5, %s866_s8, %s866_s8, %s867_s9  }
  0x48   : > { %p1157_p0 = scmp.ne.s32.totalorder %s1152_s20, 0 }
  0x49   : > { %s1037_s6 = sand.u32 (!%p1157_p0), 1, %s855_s13   ;;  %p1158_p5 = scmp.ne.s32.totalorder (!%p1157_p0), %s1150_s18, 0 }
  0x4a   : > { %171 = sbr.rel (%p1157_p0) target bundleno = 362 (0x16a), region = 32  ;;  %s527_s7 = sshll.u32 (!%p1157_p0), %s1037_s6, 7 }
  0x4b   : > { %s174_s10 = scalar_lea.sflag (!%p1157_p0), [#allocation3], %s1037_s6  ;;  %s1043_s26 = scalar_lea.vmem (!%p1157_p0), [#allocation2], %s527_s7 }
  0x51   : > { %838 = dma.done.wait (%p1158_p5), %s174_s10, 2048  }
  0x52   : > { %840 = vsyncadd (%p1158_p5), %s174_s10, 4294965248  ;;  %p1159_p11 = scmp.eq.s32.totalorder %s913_s16, 0 }
  0x54   : > { %842 = dma.done.wait (%p1159_p11), [#allocation6], 2048   ;;  %p1160_p2 = pmov %p1159_p11 }
  0x55   : > { %v238_v0 = vld [vmem:[#allocation5] sm:$0xff]  ;;  %v239_v1 = vld [vmem:[#allocation5 + $0x8] sm:$0xff]  ;;  %v240_v2 = vld [vmem:[#allocation5 + $0x10] sm:$0xff]  ;;  %s1074_s8 = scalar_lea.vmem [#allocation7], %s527_s7  ;;  %s537_s9 = sshll.u32 %s913_s16, 11 }
  0x56   : > { %844 = vsyncadd (%p1160_p2), [#allocation6], 4294965248  ;;  %v626_v3 = vpack.c.bf16 %v239_v1, %v238_v0  ;;  %v241_v4 = vld [vmem:[#allocation5 + $0x18] sm:$0xff]  ;;  %v242_v6 = vld [vmem:[#allocation5 + $0x20] sm:$0xff]  ;;  %s436_s4 = sshll.u32 %s1074_s8, 4  ;;  %s1093_s16 = scalar_lea.hbm %s1146_s3, %s537_s9  ;;  %s1095_s4 = int_to_ptr.vmem [resolvable:$true] %s436_s4 }
  0x57   : > { %v630_v5 = vpack.c.bf16 %v241_v4, %v240_v2  ;;  %v243_v7 = vld [vmem:[#allocation5 + $0x28] sm:$0xff]  ;;  %v206_v9 = vld [vmem:[%s1043_s26] sm:$0xff]  ;;  %v244_v11 = vld [vmem:[#allocation5 + $0x30] sm:$0xff]  ;;  %s423_s11 = scalar_lea.sflag [#allocation4], %s1037_s6  ;;  %s793_s27 = scalar_lea.vmem %s1095_s4, 2048 }
  0x58   : > { %627 = vmatprep.subr.bf16.mxu0 %v626_v3  ;;  %658 = vmatprep.subr.bf16.mxu1 %v626_v3  ;;  %v634_v8 = vpack.c.bf16 %v243_v7, %v242_v6  ;;  %v214_v10 = vld [vmem:[%s1043_s26 + $0x40] sm:$0xff]  ;;  %v245_v12 = vld [vmem:[#allocation5 + $0x38] sm:$0xff]  ;;  %v222_v13 = vmax.f32 %v206_v9, 0.0  ;;  %v247_v17 = vld [vmem:[#allocation5 + $0x48] sm:$0xff]  ;;  %p794_p4 = scmp.ne.s32.totalorder %s1095_s4, %s793_s27  ;;  %s869_s28 = smov [#allocation7]  }
  0x59   : > { %629 = vmatpush3.bf16.msra.mxu0 %v626_v3  ;;  %666 = vmatpush3.bf16.msra.mxu1 %v626_v3  ;;  %v230_v14 = vmax.f32 %v214_v10, 0.0  ;;  %v638_v15 = vpack.c.bf16 %v245_v12, %v244_v11  ;;  %v246_v16 = vld [vmem:[#allocation5 + $0x40] sm:$0xff]  ;;  %v248_v19 = vld [vmem:[#allocation5 + $0x50] sm:$0xff]  ;;  %v249_v20 = vld [vmem:[#allocation5 + $0x58] sm:$0xff]  ;;  %s797_s23 = sshll.u32 %s869_s28, 4  ;;  %s798_s23 = int_to_ptr.vmem [resolvable:$false] %s797_s23 }
  0x5a   : > { %631 = vmatprep.subr.bf16.mxu0 %v630_v5  ;;  %659 = vmatprep.subr.bf16.mxu1 %v630_v5  ;;  %v642_v18 = vpack.c.bf16 %v247_v17, %v246_v16  ;;  %v646_v21 = vpack.c.bf16 %v249_v20, %v248_v19  ;;  %v250_v22 = vld [vmem:[#allocation5 + $0x60] sm:$0xff]  ;;  %v251_v23 = vld [vmem:[#allocation5 + $0x68] sm:$0xff]  ;;  %v252_v25 = vld [vmem:[#allocation5 + $0x70] sm:$0xff]  ;;  %p795_p6 = pnand %p794_p4, %p986_p12  ;;  %s799_s29 = scalar_lea.vmem %s798_s23, 4096 }
  0x5b   : > { %602 = vmatprep.mubr.f32.mxu0 %v222_v13  ;;  %614 = vmatprep.mubr.f32.mxu1 %v230_v14  ;;  %v650_v24 = vpack.c.bf16 %v251_v23, %v250_v22  ;;  %v253_v26 = vld [vmem:[#allocation5 + $0x78] sm:$0xff]  ;;  %v207_v28 = vld [vmem:[%s1043_s26 + $0x8] sm:$0xff]  ;;  %v208_v30 = vld [vmem:[%s1043_s26 + $0x10] sm:$0xff]  ;;  %p800_p10 = scmp.lt.s32.totalorder %s1095_s4, %s798_s23  ;;  %p801_p13 = scmp.lt.s32.totalorder %s799_s29, %s793_s27 }
  0x5c   : > { %v654_v27 = vpack.c.bf16 %v253_v26, %v252_v25  ;;  %v215_v29 = vld [vmem:[%s1043_s26 + $0x48] sm:$0xff]  ;;  %v216_v31 = vld [vmem:[%s1043_s26 + $0x50] sm:$0xff]  ;;  %v223_v32 = vmax.f32 %v207_v28, 0.0  ;;  %v224_v34 = vmax.f32 %v208_v30, 0.0  ;;  %v209_v36 = vld [vmem:[%s1043_s26 + $0x18] sm:$0xff]  ;;  %p796_p8 = pneg %p795_p6 }
  0x5d   : > { %633 = vmatpush3.bf16.msra.mxu0 %v630_v5  ;;  %667 = vmatpush3.bf16.msra.mxu1 %v630_v5  ;;  %v231_v33 = vmax.f32 %v215_v29, 0.0  ;;  %v232_v35 = vmax.f32 %v216_v31, 0.0  ;;  %v217_v37 = vld [vmem:[%s1043_s26 + $0x58] sm:$0xff]  ;;  %v210_v38 = vld [vmem:[%s1043_s26 + $0x20] sm:$0xff]  ;;  %v225_v40 = vmax.f32 %v209_v36, 0.0  ;;  %v211_v44 = vld [vmem:[%s1043_s26 + $0x28] sm:$0xff]  ;;  %p802_p3 = por %p801_p13, %p800_p10 }
  0x5e   : > { %635 = vmatprep.subr.bf16.mxu0 %v634_v8  ;;  %660 = vmatprep.subr.bf16.mxu1 %v634_v8  ;;  %v218_v39 = vld [vmem:[%s1043_s26 + $0x60] sm:$0xff]  ;;  %v233_v41 = vmax.f32 %v217_v37, 0.0  ;;  %v226_v42 = vmax.f32 %v210_v38, 0.0  ;;  %v219_v45 = vld [vmem:[%s1043_s26 + $0x68] sm:$0xff]  ;;  %v212_v46 = vld [vmem:[%s1043_s26 + $0x30] sm:$0xff]  ;;  %v227_v48 = vmax.f32 %v211_v44, 0.0 }
  0x5f   : > { %v234_v43 = vmax.f32 %v218_v39, 0.0  ;;  %v220_v47 = vld [vmem:[%s1043_s26 + $0x70] sm:$0xff]  ;;  %v235_v49 = vmax.f32 %v219_v45, 0.0  ;;  %v228_v50 = vmax.f32 %v212_v46, 0.0  ;;  %v213_v52 = vld [vmem:[%s1043_s26 + $0x38] sm:$0xff]  ;;  %p803_p7 = pnand %p802_p3, %p796_p8 }
  0x60   : > { %v236_v51 = vmax.f32 %v220_v47, 0.0  ;;  %v221_v53 = vld [vmem:[%s1043_s26 + $0x78] sm:$0xff]  ;;  %v229_v54 = vmax.f32 %v213_v52, 0.0  ;;  %v530_v56 = vld [vmem:[%s1145_s2] ss:$0 sm:$0xff] }
  0x61   : > { %637 = vmatpush3.bf16.msra.mxu0 %v634_v8  ;;  %668 = vmatpush3.bf16.msra.mxu1 %v634_v8  ;;  %v237_v55 = vmax.f32 %v221_v53, 0.0 }
  0x62   : > { %639 = vmatprep.subr.bf16.mxu0 %v638_v15  ;;  %661 = vmatprep.subr.bf16.mxu1 %v638_v15 }
  0x65   : > { %641 = vmatpush3.bf16.msra.mxu0 %v638_v15  ;;  %669 = vmatpush3.bf16.msra.mxu1 %v638_v15 }
  0x66   : > { %643 = vmatprep.subr.bf16.mxu0 %v642_v18  ;;  %662 = vmatprep.subr.bf16.mxu1 %v642_v18 }
  0x69   : > { %645 = vmatpush3.bf16.msra.mxu0 %v642_v18  ;;  %670 = vmatpush3.bf16.msra.mxu1 %v642_v18 }
  0x6a   : > { %647 = vmatprep.subr.bf16.mxu0 %v646_v21  ;;  %663 = vmatprep.subr.bf16.mxu1 %v646_v21 }
  0x6d   : > { %649 = vmatpush3.bf16.msra.mxu0 %v646_v21  ;;  %671 = vmatpush3.bf16.msra.mxu1 %v646_v21 }
  0x6e   : > { %651 = vmatprep.subr.bf16.mxu0 %v650_v24  ;;  %664 = vmatprep.subr.bf16.mxu1 %v650_v24 }
  0x71   : > { %653 = vmatpush3.bf16.msra.mxu0 %v650_v24  ;;  %672 = vmatpush3.bf16.msra.mxu1 %v650_v24 }
  0x72   : > { %655 = vmatprep.subr.bf16.mxu0 %v654_v27  ;;  %665 = vmatprep.subr.bf16.mxu1 %v654_v27 }
  0x75   : > { %657 = vmatpush3.bf16.msra.mxu0 %v654_v27  ;;  %673 = vmatpush3.bf16.msra.mxu1 %v654_v27 }
  0x78   : > { %603 = vmatmul.mubr.f32.vlgmr.msra.gmra.mrb[0].mxu0 %v223_v32  ;;  %615 = vmatmul.mubr.f32.vlgmr.msra.gmra.mrb[0].mxu1 %v231_v33 }
  0x79   : > { %605 = vmatprep.mubr.f32.mxu0 %v224_v34  ;;  %617 = vmatprep.mubr.f32.mxu1 %v232_v35 }
  0x7c   : > { %606 = vmatmul.mubr.f32.gmra.mrb[2].mxu0 %v225_v40  ;;  %618 = vmatmul.mubr.f32.gmra.mrb[2].mxu1 %v233_v41 }
  0x7d   : > { %608 = vmatprep.mubr.f32.mxu0 %v226_v42  ;;  %620 = vmatprep.mubr.f32.mxu1 %v234_v43 }
  0x80   : > { %609 = vmatmul.mubr.f32.gmra.mrb[4].mxu0 %v227_v48  ;;  %621 = vmatmul.mubr.f32.gmra.mrb[4].mxu1 %v235_v49 }
  0x81   : > { %611 = vmatprep.mubr.f32.mxu0 %v228_v50  ;;  %623 = vmatprep.mubr.f32.mxu1 %v236_v51 }
  0x84   : > { %612 = vmatmul.mubr.f32.gmra.mrb[6].mxu0 %v229_v54  ;;  %624 = vmatmul.mubr.f32.gmra.mrb[6].mxu1 %v237_v55 }
 0x14b   : > { %v604_v57 = vpop.f32.mrb[0].mxu0  ;;  %v616_v58 = vpop.f32.mrb[0].mxu1 }
 0x14c   : > { %v333_v59 = vadd.f32 %v604_v57, %v530_v56  ;;  %v373_v60 = vadd.f32 %v616_v58, %v530_v56  ;;  %v327_v61 = vpop.f32.mrb[1].mxu0  ;;  %v367_v62 = vpop.f32.mrb[1].mxu1 }
 0x14d   : > { %v328_v63 = vadd.f32 %v530_v56, %v327_v61  ;;  %v368_v0 = vadd.f32 %v530_v56, %v367_v62 }
 0x14e   : > { %407 = vst [vmem:[%s1074_s8 + $0x8] sm:$0xff] %v333_v59  ;;  %415 = vst [vmem:[%s1074_s8 + $0x48] sm:$0xff] %v373_v60 }
 0x14f   : > { %406 = vst [vmem:[%s1074_s8] sm:$0xff] %v328_v63  ;;  %414 = vst [vmem:[%s1074_s8 + $0x40] sm:$0xff] %v368_v0  ;;  %v607_v1 = vpop.f32.mrb[2].mxu0  ;;  %v619_v2 = vpop.f32.mrb[2].mxu1 }
 0x150   : > { %v343_v3 = vadd.f32 %v607_v1, %v530_v56  ;;  %v383_v4 = vadd.f32 %v619_v2, %v530_v56  ;;  %v337_v5 = vpop.f32.mrb[3].mxu0  ;;  %v377_v6 = vpop.f32.mrb[3].mxu1 }
 0x151   : > { %v338_v7 = vadd.f32 %v530_v56, %v337_v5  ;;  %v378_v8 = vadd.f32 %v530_v56, %v377_v6 }
 0x152   : > { %409 = vst [vmem:[%s1074_s8 + $0x18] sm:$0xff] %v343_v3  ;;  %417 = vst [vmem:[%s1074_s8 + $0x58] sm:$0xff] %v383_v4 }
 0x153   : > { %408 = vst [vmem:[%s1074_s8 + $0x10] sm:$0xff] %v338_v7  ;;  %416 = vst [vmem:[%s1074_s8 + $0x50] sm:$0xff] %v378_v8  ;;  %v610_v9 = vpop.f32.mrb[4].mxu0  ;;  %v622_v10 = vpop.f32.mrb[4].mxu1 }
 0x154   : > { %v353_v11 = vadd.f32 %v610_v9, %v530_v56  ;;  %v393_v12 = vadd.f32 %v622_v10, %v530_v56  ;;  %v347_v13 = vpop.f32.mrb[5].mxu0  ;;  %v387_v14 = vpop.f32.mrb[5].mxu1 }
 0x155   : > { %v348_v15 = vadd.f32 %v530_v56, %v347_v13  ;;  %v388_v16 = vadd.f32 %v530_v56, %v387_v14 }
 0x156   : > { %411 = vst [vmem:[%s1074_s8 + $0x28] sm:$0xff] %v353_v11  ;;  %419 = vst [vmem:[%s1074_s8 + $0x68] sm:$0xff] %v393_v12 }
 0x157   : > { %410 = vst [vmem:[%s1074_s8 + $0x20] sm:$0xff] %v348_v15  ;;  %418 = vst [vmem:[%s1074_s8 + $0x60] sm:$0xff] %v388_v16  ;;  %v613_v17 = vpop.f32.mrb[6].mxu0  ;;  %v625_v18 = vpop.f32.mrb[6].mxu1 }
 0x158   : > { %v363_v19 = vadd.f32 %v613_v17, %v530_v56  ;;  %v403_v20 = vadd.f32 %v625_v18, %v530_v56  ;;  %v357_v21 = vpop.f32.mrb[7].mxu0  ;;  %v397_v22 = vpop.f32.mrb[7].mxu1 }
 0x159   : > { %v358_v23 = vadd.f32 %v530_v56, %v357_v21  ;;  %v398_v24 = vadd.f32 %v530_v56, %v397_v22 }
 0x15a   : > { %413 = vst [vmem:[%s1074_s8 + $0x38] sm:$0xff] %v363_v19  ;;  %421 = vst [vmem:[%s1074_s8 + $0x78] sm:$0xff] %v403_v20 }
 0x15b   : > { %412 = vst [vmem:[%s1074_s8 + $0x30] sm:$0xff] %v358_v23  ;;  %420 = vst [vmem:[%s1074_s8 + $0x70] sm:$0xff] %v398_v24 }
 0x15c   : > { %806 = shalt.err (!%p803_p7)
}
 0x15d   : > { %s807_s30 = scalar_lea.hbm %s1093_s16, 2048  ;;  %s811_s10 = scalar_lea.hbm %s1146_s3, 4096 }
 0x15e   : > { %p808_p9 = scmp.ne.s32.totalorder %s1093_s16, %s807_s30  ;;  %p812_p5 = scmp.lt.u32.totalorder %s1093_s16, %s1146_s3 }
 0x15f   : > { %p813_p11 = scmp.lt.u32.totalorder %s811_s10, %s807_s30  ;;  %p815_p4 = scmp.lt.u32.totalorder %s807_s30, %s1093_s16 }
 0x160   : > { %p809_p1 = pnand %p808_p9, %p986_p12 }
 0x161   : > { %p814_p2 = por %p813_p11, %p812_p5 }
 0x162   : > { %p810_p0 = pneg %p809_p1 }
 0x163   : > { %p816_p6 = por %p815_p4, %p814_p2 }
 0x165   : > { %p817_p8 = pnand %p816_p6, %p810_p0 }
 0x167   : > { %820 = shalt.err (!%p817_p8)
}
 0x168   : > { %s870_s20 = smov 128   ;;  %s871_s8 = smov 8  }
 0x169   : > { %680 = dma.vmem_to_hbm [thread:$0]  (%p986_p12), %s1095_s4, 2048, %s1093_s16, %s423_s11, %s870_s20, %s870_s20, %s871_s8  }
 0x16a PF: > { %s451_s9 = sand.u32 1, %s851_s12   ;;  %p1161_p10 = scmp.ne.s32.totalorder %s1151_s19, 0 }
 0x16b   : > { %p1162_p13 = scmp.ge.s32.totalorder %s863_s15, 2  ;;  %s452_s25 = scalar_lea.sflag [#allocation4], %s451_s9 }
 0x16d   : > { %p691_p3 = pnand %p1162_p13, %p1161_p10 }
 0x16f   : > { %846 = dma.done.wait (!%p691_p3), %s452_s25, 2048  }
 0x170   : > { %848 = vsyncadd (!%p691_p3), %s452_s25, 4294965248  ;;  %p17_p7 = scmp.ge.s32.totalorder %s948_s24, 4   ;;  %s1163_s12 = smov %s855_s13 }
 0x171   : > { %s1164_s13 = smov %s859_s14  ;;  %s1165_s14 = smov %s982_s17 }
 0x172   : > { %s1166_s15 = smov %s948_s24  ;;  %19 = sbr.rel (!%p17_p7) target bundleno = 6 (0x6), region = 81 }
 0x179   :  { %457 = vsyncpa [#allocation3], 1 }
 0x17a   :  { %459 = vsyncpa [#allocation3 + $0x1], 1 }
 0x17b   :  { %460 = vsyncpa [#allocation6], 1 }
 0x17c   :  { %461 = vsyncpa [#allocation4], 1 }
 0x17d   :  { %463 = vsyncpa [#allocation4 + $0x1], 1 }

// kernel: tpu_custom_call.1
= control target key start
LH: loop header
LB: loop body
LE: loop exit
PB: predicated region body
PF: predicated region fallthrough
CT: control target
= control target key end

     0   :  { %8 = vsyncpa [#allocation3], 0  ;;  %s1143_s0 = inlined_call_operand.hbm [shape: f32[256,128], index: 0, kind: input, shape index: {}]   ;;  %s1144_s1 = inlined_call_operand.hbm [shape: f32[128,128], index: 1, kind: input, shape index: {}]   ;;  %s1145_s2 = inlined_call_operand.vmem [shape: f32[1,128], index: 2, kind: input, shape index: {}]   ;;  %s1146_s3 = inlined_call_operand.hbm [shape: f32[256,128], index: 3, kind: output, shape index: {}]  }
   0x1   :  { %10 = vsyncpa [#allocation3 + $0x1], 0 }
   0x2   :  { %11 = vsyncpa [#allocation6], 0 }
   0x3   :  { %12 = vsyncpa [#allocation4], 0 }
   0x4   :  { %14 = vsyncpa [#allocation4 + $0x1], 0  ;;  %s892_s12 = smov 0   ;;  %s894_s13 = smov 0  }
   0x5   :  { %s896_s14 = smov 0   ;;  %s898_s15 = smov 0  }
   0x6 LB: > { %s913_s16 = sadd.s32 4294967295, %s863_s15   ;;  %s519_s17 = sadd.s32 4294967294, %s863_s15   ;;  %s863_s15 = sphi %s898_s15, %s1166_s15   ;;  %s859_s14 = sphi %s896_s14, %s1165_s14   ;;  %s855_s13 = sphi %s894_s13, %s1164_s13   ;;  %s851_s12 = sphi %s892_s12, %s1163_s12  }
   0x7   : > { %p40_p0 = scmp.ne.s32.totalorder %s855_s13, %s851_s12  ;;  %p1147_p1 = scmp.eq.s32.totalorder %s913_s16, 0 }
   0x8   : > { %p112_p3 = scmp.eq.s32.totalorder %s519_s17, 1  ;;  %p520_p5 = scmp.ge.s32.totalorder %s863_s15, 1 }
   0x9   : > { %p922_p4 = por %p1147_p1, %p40_p0  ;;  %p119_p7 = scmp.lt.s32.totalorder %s863_s15, 3 }
   0xa   : > { %p927_p6 = por %p112_p3, %p40_p0  ;;  %s865_s21 = smov [#allocation5]  }
   0xb   : > { %s1150_s18 = scalar_select %p922_p4, 1, 0 }
   0xc   : > { %s1151_s19 = scalar_select %p927_p6, 1, 0 }
   0xd   : > { %p932_p8 = pnand %p520_p5, %p119_p7  ;;  %s131_s22 = sshll.u32 %s865_s21, 4  ;;  %s936_s22 = int_to_ptr.vmem [resolvable:$true] %s131_s22 }
   0xe   : > { %s948_s24 = sadd.s32 1, %s863_s15   ;;  %s27_s25 = sadd.s32 1, %s859_s14 }
   0xf   : > { %s1152_s20 = scalar_select %p932_p8, 1, 0 }
  0x10   : > { %p682_p9 = pneg %p932_p8  ;;  %s24_s26 = ssub.s32 %s863_s15, %s948_s24 }
  0x11   : > { %s735_s29 = scalar_lea.hbm %s1144_s1, 2048 }
  0x12   : > { %p943_p11 = pnand %p682_p9, %p1147_p1  ;;  %p736_p12 = scmp.ne.s32.totalorder %s1144_s1, %s735_s29 }
  0x13   : > { %p742_p5 = scmp.lt.u32.totalorder %s735_s29, %s1144_s1 }
  0x14   : > { %p737_p13 = pneg %p943_p11 }
  0x16   : > { %p738_p0 = pnand %p737_p13, %p736_p12 }
  0x18   : > { %p739_p3 = pneg %p738_p0 }
  0x1a   : > { %p744_p7 = pnand %p742_p5, %p739_p3 }
  0x1c   : > { %747 = shalt.err (!%p744_p7)
}
  0x1d   : > { %s748_s7 = scalar_lea.vmem %s936_s22, 2048  ;;  %p756_p2 = scmp.lt.s32.totalorder %s936_s22, %s936_s22 }
  0x1e   : > { %p749_p9 = scmp.ne.s32.totalorder %s936_s22, %s748_s7  ;;  %p757_p6 = scmp.lt.s32.totalorder %s748_s7, %s748_s7 }
  0x20   : > { %p751_p10 = pnand %p749_p9, %p737_p13  ;;  %p758_p4 = por %p757_p6, %p756_p2 }
  0x22   : > { %p752_p1 = pneg %p751_p10 }
  0x24   : > { %p759_p8 = pnand %p758_p4, %p752_p1 }
  0x26   : > { %762 = shalt.err (!%p759_p8)
}
  0x27   : > { %s866_s8 = smov 128   ;;  %s867_s9 = smov 8  }
  0x28   : > { %685 = dma.hbm_to_vmem [thread:$0]  (!%p943_p11), %s1144_s1, 2048, %s936_s22, [#allocation6], %s866_s8, %s866_s8, %s867_s9  }
  0x29   : > { %p25_p1 = scmp.eq.s32.totalorder %s24_s26, 0  ;;  %p34_p2 = scmp.ne.s32.totalorder %s859_s14, %s855_s13 }
  0x2a   : > { %p35_p4 = scmp.eq.s32.totalorder %s863_s15, 0  ;;  %p695_p6 = scmp.lt.s32.totalorder %s863_s15, 2 }
  0x2b   : > { %s982_s17 = scalar_select %p25_p1, %s859_s14, %s27_s25  }
  0x2c   : > { %p36_p8 = por %p35_p4, %p34_p2  ;;  %p1154_p10 = scmp.eq.s32.totalorder %s913_s16, 1 }
  0x2d   : > { %s148_s23 = sand.u32 1, %s859_s14   ;;  %s536_s27 = sshll.u32 %s863_s15, 11 }
  0x2e   : > { %p986_p12 = por %p1154_p10, %p34_p2  ;;  %s523_s28 = sshll.u32 %s148_s23, 7 }
  0x2f   : > { %s995_s4 = scalar_lea.hbm %s1143_s0, %s536_s27  ;;  %s152_s22 = scalar_lea.vmem [#allocation2], %s523_s28 }
  0x30   : > { %s159_s25 = sshll.u32 %s152_s22, 4  ;;  %p997_p11 = pnand %p695_p6, %p36_p8  ;;  %s1001_s25 = int_to_ptr.vmem [resolvable:$true] %s159_s25 }
  0x31   : > { %s1003_s5 = scalar_lea.sflag [#allocation3], %s148_s23  ;;  %s763_s6 = scalar_lea.hbm %s995_s4, 2048 }
  0x32   : > { %p764_p13 = scmp.ne.s32.totalorder %s995_s4, %s763_s6  ;;  %p765_p0 = pneg %p997_p11 }
  0x33   : > { %s768_s11 = scalar_lea.hbm %s1143_s0, 4096  ;;  %p769_p7 = scmp.lt.u32.totalorder %s995_s4, %s1143_s0 }
  0x34   : > { %p766_p3 = pnand %p765_p0, %p764_p13  ;;  %p770_p9 = scmp.lt.u32.totalorder %s768_s11, %s763_s6 }
  0x35   : > { %p772_p2 = scmp.lt.u32.totalorder %s763_s6, %s995_s4 }
  0x36   : > { %p767_p5 = pneg %p766_p3  ;;  %p771_p1 = por %p770_p9, %p769_p7 }
  0x38   : > { %p773_p4 = por %p772_p2, %p771_p1 }
  0x3a   : > { %p774_p6 = pnand %p773_p4, %p767_p5 }
  0x3c   : > { %777 = shalt.err (!%p774_p6)
}
  0x3d   : > { %s778_s23 = scalar_lea.vmem %s1001_s25, 2048  ;;  %s868_s29 = smov [#allocation2]  }
  0x3e   : > { %p779_p8 = scmp.ne.s32.totalorder %s1001_s25, %s778_s23  ;;  %s783_s30 = sshll.u32 %s868_s29, 4  ;;  %s784_s30 = int_to_ptr.vmem [resolvable:$false] %s783_s30 }
  0x3f   : > { %s785_s22 = scalar_lea.vmem %s784_s30, 4096  ;;  %p786_p3 = scmp.lt.s32.totalorder %s1001_s25, %s784_s30 }
  0x40   : > { %p781_p10 = pnand %p779_p8, %p765_p0  ;;  %p787_p7 = scmp.lt.s32.totalorder %s785_s22, %s778_s23 }
  0x42   : > { %p782_p13 = pneg %p781_p10  ;;  %p788_p9 = por %p787_p7, %p786_p3 }
  0x44   : > { %p789_p1 = pnand %p788_p9, %p782_p13 }
  0x46   : > { %792 = shalt.err (!%p789_p1)
}
  0x47   : > { %689 = dma.hbm_to_vmem [thread:$0]  (!%p997_p11), %s995_s4, 2048, %s1001_s25, %s1003_s5, %s866_s8, %s866_s8, %s867_s9  }
  0x48   : > { %p1157_p0 = scmp.ne.s32.totalorder %s1152_s20, 0 }
  0x49   : > { %s1037_s6 = sand.u32 (!%p1157_p0), 1, %s855_s13   ;;  %p1158_p5 = scmp.ne.s32.totalorder (!%p1157_p0), %s1150_s18, 0 }
  0x4a   : > { %171 = sbr.rel (%p1157_p0) target bundleno = 362 (0x16a), region = 32  ;;  %s527_s7 = sshll.u32 (!%p1157_p0), %s1037_s6, 7 }
  0x4b   : > { %s174_s10 = scalar_lea.sflag (!%p1157_p0), [#allocation3], %s1037_s6  ;;  %s1043_s26 = scalar_lea.vmem (!%p1157_p0), [#allocation2], %s527_s7 }
  0x51   : > { %838 = dma.done.wait (%p1158_p5), %s174_s10, 2048  }
  0x52   : > { %840 = vsyncadd (%p1158_p5), %s174_s10, 4294965248  ;;  %p1159_p11 = scmp.eq.s32.totalorder %s913_s16, 0 }
  0x54   : > { %842 = dma.done.wait (%p1159_p11), [#allocation6], 2048   ;;  %p1160_p2 = pmov %p1159_p11 }
  0x55   : > { %v238_v0 = vld [vmem:[#allocation5] sm:$0xff]  ;;  %v239_v1 = vld [vmem:[#allocation5 + $0x8] sm:$0xff]  ;;  %v240_v2 = vld [vmem:[#allocation5 + $0x10] sm:$0xff]  ;;  %s1074_s8 = scalar_lea.vmem [#allocation7], %s527_s7  ;;  %s537_s9 = sshll.u32 %s913_s16, 11 }
  0x56   : > { %844 = vsyncadd (%p1160_p2), [#allocation6], 4294965248  ;;  %v626_v3 = vpack.c.bf16 %v239_v1, %v238_v0  ;;  %v241_v4 = vld [vmem:[#allocation5 + $0x18] sm:$0xff]  ;;  %v242_v6 = vld [vmem:[#allocation5 + $0x20] sm:$0xff]  ;;  %s436_s4 = sshll.u32 %s1074_s8, 4  ;;  %s1093_s16 = scalar_lea.hbm %s1146_s3, %s537_s9  ;;  %s1095_s4 = int_to_ptr.vmem [resolvable:$true] %s436_s4 }
  0x57   : > { %v630_v5 = vpack.c.bf16 %v241_v4, %v240_v2  ;;  %v243_v7 = vld [vmem:[#allocation5 + $0x28] sm:$0xff]  ;;  %v206_v9 = vld [vmem:[%s1043_s26] sm:$0xff]  ;;  %v244_v11 = vld [vmem:[#allocation5 + $0x30] sm:$0xff]  ;;  %s423_s11 = scalar_lea.sflag [#allocation4], %s1037_s6  ;;  %s793_s27 = scalar_lea.vmem %s1095_s4, 2048 }
  0x58   : > { %627 = vmatprep.subr.bf16.mxu0 %v626_v3  ;;  %658 = vmatprep.subr.bf16.mxu1 %v626_v3  ;;  %v634_v8 = vpack.c.bf16 %v243_v7, %v242_v6  ;;  %v214_v10 = vld [vmem:[%s1043_s26 + $0x40] sm:$0xff]  ;;  %v245_v12 = vld [vmem:[#allocation5 + $0x38] sm:$0xff]  ;;  %v222_v13 = vmax.f32 %v206_v9, 0.0  ;;  %v247_v17 = vld [vmem:[#allocation5 + $0x48] sm:$0xff]  ;;  %p794_p4 = scmp.ne.s32.totalorder %s1095_s4, %s793_s27  ;;  %s869_s28 = smov [#allocation7]  }
  0x59   : > { %629 = vmatpush3.bf16.msra.mxu0 %v626_v3  ;;  %666 = vmatpush3.bf16.msra.mxu1 %v626_v3  ;;  %v230_v14 = vmax.f32 %v214_v10, 0.0  ;;  %v638_v15 = vpack.c.bf16 %v245_v12, %v244_v11  ;;  %v246_v16 = vld [vmem:[#allocation5 + $0x40] sm:$0xff]  ;;  %v248_v19 = vld [vmem:[#allocation5 + $0x50] sm:$0xff]  ;;  %v249_v20 = vld [vmem:[#allocation5 + $0x58] sm:$0xff]  ;;  %s797_s23 = sshll.u32 %s869_s28, 4  ;;  %s798_s23 = int_to_ptr.vmem [resolvable:$false] %s797_s23 }
  0x5a   : > { %631 = vmatprep.subr.bf16.mxu0 %v630_v5  ;;  %659 = vmatprep.subr.bf16.mxu1 %v630_v5  ;;  %v642_v18 = vpack.c.bf16 %v247_v17, %v246_v16  ;;  %v646_v21 = vpack.c.bf16 %v249_v20, %v248_v19  ;;  %v250_v22 = vld [vmem:[#allocation5 + $0x60] sm:$0xff]  ;;  %v251_v23 = vld [vmem:[#allocation5 + $0x68] sm:$0xff]  ;;  %v252_v25 = vld [vmem:[#allocation5 + $0x70] sm:$0xff]  ;;  %p795_p6 = pnand %p794_p4, %p986_p12  ;;  %s799_s29 = scalar_lea.vmem %s798_s23, 4096 }
  0x5b   : > { %602 = vmatprep.mubr.f32.mxu0 %v222_v13  ;;  %614 = vmatprep.mubr.f32.mxu1 %v230_v14  ;;  %v650_v24 = vpack.c.bf16 %v251_v23, %v250_v22  ;;  %v253_v26 = vld [vmem:[#allocation5 + $0x78] sm:$0xff]  ;;  %v207_v28 = vld [vmem:[%s1043_s26 + $0x8] sm:$0xff]  ;;  %v208_v30 = vld [vmem:[%s1043_s26 + $0x10] sm:$0xff]  ;;  %p800_p10 = scmp.lt.s32.totalorder %s1095_s4, %s798_s23  ;;  %p801_p13 = scmp.lt.s32.totalorder %s799_s29, %s793_s27 }
  0x5c   : > { %v654_v27 = vpack.c.bf16 %v253_v26, %v252_v25  ;;  %v215_v29 = vld [vmem:[%s1043_s26 + $0x48] sm:$0xff]  ;;  %v216_v31 = vld [vmem:[%s1043_s26 + $0x50] sm:$0xff]  ;;  %v223_v32 = vmax.f32 %v207_v28, 0.0  ;;  %v224_v34 = vmax.f32 %v208_v30, 0.0  ;;  %v209_v36 = vld [vmem:[%s1043_s26 + $0x18] sm:$0xff]  ;;  %p796_p8 = pneg %p795_p6 }
  0x5d   : > { %633 = vmatpush3.bf16.msra.mxu0 %v630_v5  ;;  %667 = vmatpush3.bf16.msra.mxu1 %v630_v5  ;;  %v231_v33 = vmax.f32 %v215_v29, 0.0  ;;  %v232_v35 = vmax.f32 %v216_v31, 0.0  ;;  %v217_v37 = vld [vmem:[%s1043_s26 + $0x58] sm:$0xff]  ;;  %v210_v38 = vld [vmem:[%s1043_s26 + $0x20] sm:$0xff]  ;;  %v225_v40 = vmax.f32 %v209_v36, 0.0  ;;  %v211_v44 = vld [vmem:[%s1043_s26 + $0x28] sm:$0xff]  ;;  %p802_p3 = por %p801_p13, %p800_p10 }
  0x5e   : > { %635 = vmatprep.subr.bf16.mxu0 %v634_v8  ;;  %660 = vmatprep.subr.bf16.mxu1 %v634_v8  ;;  %v218_v39 = vld [vmem:[%s1043_s26 + $0x60] sm:$0xff]  ;;  %v233_v41 = vmax.f32 %v217_v37, 0.0  ;;  %v226_v42 = vmax.f32 %v210_v38, 0.0  ;;  %v219_v45 = vld [vmem:[%s1043_s26 + $0x68] sm:$0xff]  ;;  %v212_v46 = vld [vmem:[%s1043_s26 + $0x30] sm:$0xff]  ;;  %v227_v48 = vmax.f32 %v211_v44, 0.0 }
  0x5f   : > { %v234_v43 = vmax.f32 %v218_v39, 0.0  ;;  %v220_v47 = vld [vmem:[%s1043_s26 + $0x70] sm:$0xff]  ;;  %v235_v49 = vmax.f32 %v219_v45, 0.0  ;;  %v228_v50 = vmax.f32 %v212_v46, 0.0  ;;  %v213_v52 = vld [vmem:[%s1043_s26 + $0x38] sm:$0xff]  ;;  %p803_p7 = pnand %p802_p3, %p796_p8 }
  0x60   : > { %v236_v51 = vmax.f32 %v220_v47, 0.0  ;;  %v221_v53 = vld [vmem:[%s1043_s26 + $0x78] sm:$0xff]  ;;  %v229_v54 = vmax.f32 %v213_v52, 0.0  ;;  %v530_v56 = vld [vmem:[%s1145_s2] ss:$0 sm:$0xff] }
  0x61   : > { %637 = vmatpush3.bf16.msra.mxu0 %v634_v8  ;;  %668 = vmatpush3.bf16.msra.mxu1 %v634_v8  ;;  %v237_v55 = vmax.f32 %v221_v53, 0.0 }
  0x62   : > { %639 = vmatprep.subr.bf16.mxu0 %v638_v15  ;;  %661 = vmatprep.subr.bf16.mxu1 %v638_v15 }
  0x65   : > { %641 = vmatpush3.bf16.msra.mxu0 %v638_v15  ;;  %669 = vmatpush3.bf16.msra.mxu1 %v638_v15 }
  0x66   : > { %643 = vmatprep.subr.bf16.mxu0 %v642_v18  ;;  %662 = vmatprep.subr.bf16.mxu1 %v642_v18 }
  0x69   : > { %645 = vmatpush3.bf16.msra.mxu0 %v642_v18  ;;  %670 = vmatpush3.bf16.msra.mxu1 %v642_v18 }
  0x6a   : > { %647 = vmatprep.subr.bf16.mxu0 %v646_v21  ;;  %663 = vmatprep.subr.bf16.mxu1 %v646_v21 }
  0x6d   : > { %649 = vmatpush3.bf16.msra.mxu0 %v646_v21  ;;  %671 = vmatpush3.bf16.msra.mxu1 %v646_v21 }
  0x6e   : > { %651 = vmatprep.subr.bf16.mxu0 %v650_v24  ;;  %664 = vmatprep.subr.bf16.mxu1 %v650_v24 }
  0x71   : > { %653 = vmatpush3.bf16.msra.mxu0 %v650_v24  ;;  %672 = vmatpush3.bf16.msra.mxu1 %v650_v24 }
  0x72   : > { %655 = vmatprep.subr.bf16.mxu0 %v654_v27  ;;  %665 = vmatprep.subr.bf16.mxu1 %v654_v27 }
  0x75   : > { %657 = vmatpush3.bf16.msra.mxu0 %v654_v27  ;;  %673 = vmatpush3.bf16.msra.mxu1 %v654_v27 }
  0x78   : > { %603 = vmatmul.mubr.f32.vlgmr.msra.gmra.mrb[0].mxu0 %v223_v32  ;;  %615 = vmatmul.mubr.f32.vlgmr.msra.gmra.mrb[0].mxu1 %v231_v33 }
  0x79   : > { %605 = vmatprep.mubr.f32.mxu0 %v224_v34  ;;  %617 = vmatprep.mubr.f32.mxu1 %v232_v35 }
  0x7c   : > { %606 = vmatmul.mubr.f32.gmra.mrb[2].mxu0 %v225_v40  ;;  %618 = vmatmul.mubr.f32.gmra.mrb[2].mxu1 %v233_v41 }
  0x7d   : > { %608 = vmatprep.mubr.f32.mxu0 %v226_v42  ;;  %620 = vmatprep.mubr.f32.mxu1 %v234_v43 }
  0x80   : > { %609 = vmatmul.mubr.f32.gmra.mrb[4].mxu0 %v227_v48  ;;  %621 = vmatmul.mubr.f32.gmra.mrb[4].mxu1 %v235_v49 }
  0x81   : > { %611 = vmatprep.mubr.f32.mxu0 %v228_v50  ;;  %623 = vmatprep.mubr.f32.mxu1 %v236_v51 }
  0x84   : > { %612 = vmatmul.mubr.f32.gmra.mrb[6].mxu0 %v229_v54  ;;  %624 = vmatmul.mubr.f32.gmra.mrb[6].mxu1 %v237_v55 }
 0x14b   : > { %v604_v57 = vpop.f32.mrb[0].mxu0  ;;  %v616_v58 = vpop.f32.mrb[0].mxu1 }
 0x14c   : > { %v333_v59 = vadd.f32 %v604_v57, %v530_v56  ;;  %v373_v60 = vadd.f32 %v616_v58, %v530_v56  ;;  %v327_v61 = vpop.f32.mrb[1].mxu0  ;;  %v367_v62 = vpop.f32.mrb[1].mxu1 }
 0x14d   : > { %v328_v63 = vadd.f32 %v530_v56, %v327_v61  ;;  %v368_v0 = vadd.f32 %v530_v56, %v367_v62 }
 0x14e   : > { %407 = vst [vmem:[%s1074_s8 + $0x8] sm:$0xff] %v333_v59  ;;  %415 = vst [vmem:[%s1074_s8 + $0x48] sm:$0xff] %v373_v60 }
 0x14f   : > { %406 = vst [vmem:[%s1074_s8] sm:$0xff] %v328_v63  ;;  %414 = vst [vmem:[%s1074_s8 + $0x40] sm:$0xff] %v368_v0  ;;  %v607_v1 = vpop.f32.mrb[2].mxu0  ;;  %v619_v2 = vpop.f32.mrb[2].mxu1 }
 0x150   : > { %v343_v3 = vadd.f32 %v607_v1, %v530_v56  ;;  %v383_v4 = vadd.f32 %v619_v2, %v530_v56  ;;  %v337_v5 = vpop.f32.mrb[3].mxu0  ;;  %v377_v6 = vpop.f32.mrb[3].mxu1 }
 0x151   : > { %v338_v7 = vadd.f32 %v530_v56, %v337_v5  ;;  %v378_v8 = vadd.f32 %v530_v56, %v377_v6 }
 0x152   : > { %409 = vst [vmem:[%s1074_s8 + $0x18] sm:$0xff] %v343_v3  ;;  %417 = vst [vmem:[%s1074_s8 + $0x58] sm:$0xff] %v383_v4 }
 0x153   : > { %408 = vst [vmem:[%s1074_s8 + $0x10] sm:$0xff] %v338_v7  ;;  %416 = vst [vmem:[%s1074_s8 + $0x50] sm:$0xff] %v378_v8  ;;  %v610_v9 = vpop.f32.mrb[4].mxu0  ;;  %v622_v10 = vpop.f32.mrb[4].mxu1 }
 0x154   : > { %v353_v11 = vadd.f32 %v610_v9, %v530_v56  ;;  %v393_v12 = vadd.f32 %v622_v10, %v530_v56  ;;  %v347_v13 = vpop.f32.mrb[5].mxu0  ;;  %v387_v14 = vpop.f32.mrb[5].mxu1 }
 0x155   : > { %v348_v15 = vadd.f32 %v530_v56, %v347_v13  ;;  %v388_v16 = vadd.f32 %v530_v56, %v387_v14 }
 0x156   : > { %411 = vst [vmem:[%s1074_s8 + $0x28] sm:$0xff] %v353_v11  ;;  %419 = vst [vmem:[%s1074_s8 + $0x68] sm:$0xff] %v393_v12 }
 0x157   : > { %410 = vst [vmem:[%s1074_s8 + $0x20] sm:$0xff] %v348_v15  ;;  %418 = vst [vmem:[%s1074_s8 + $0x60] sm:$0xff] %v388_v16  ;;  %v613_v17 = vpop.f32.mrb[6].mxu0  ;;  %v625_v18 = vpop.f32.mrb[6].mxu1 }
 0x158   : > { %v363_v19 = vadd.f32 %v613_v17, %v530_v56  ;;  %v403_v20 = vadd.f32 %v625_v18, %v530_v56  ;;  %v357_v21 = vpop.f32.mrb[7].mxu0  ;;  %v397_v22 = vpop.f32.mrb[7].mxu1 }
 0x159   : > { %v358_v23 = vadd.f32 %v530_v56, %v357_v21  ;;  %v398_v24 = vadd.f32 %v530_v56, %v397_v22 }
 0x15a   : > { %413 = vst [vmem:[%s1074_s8 + $0x38] sm:$0xff] %v363_v19  ;;  %421 = vst [vmem:[%s1074_s8 + $0x78] sm:$0xff] %v403_v20 }
 0x15b   : > { %412 = vst [vmem:[%s1074_s8 + $0x30] sm:$0xff] %v358_v23  ;;  %420 = vst [vmem:[%s1074_s8 + $0x70] sm:$0xff] %v398_v24 }
 0x15c   : > { %806 = shalt.err (!%p803_p7)
}
 0x15d   : > { %s807_s30 = scalar_lea.hbm %s1093_s16, 2048  ;;  %s811_s10 = scalar_lea.hbm %s1146_s3, 4096 }
 0x15e   : > { %p808_p9 = scmp.ne.s32.totalorder %s1093_s16, %s807_s30  ;;  %p812_p5 = scmp.lt.u32.totalorder %s1093_s16, %s1146_s3 }
 0x15f   : > { %p813_p11 = scmp.lt.u32.totalorder %s811_s10, %s807_s30  ;;  %p815_p4 = scmp.lt.u32.totalorder %s807_s30, %s1093_s16 }
 0x160   : > { %p809_p1 = pnand %p808_p9, %p986_p12 }
 0x161   : > { %p814_p2 = por %p813_p11, %p812_p5 }
 0x162   : > { %p810_p0 = pneg %p809_p1 }
 0x163   : > { %p816_p6 = por %p815_p4, %p814_p2 }
 0x165   : > { %p817_p8 = pnand %p816_p6, %p810_p0 }
 0x167   : > { %820 = shalt.err (!%p817_p8)
}
 0x168   : > { %s870_s20 = smov 128   ;;  %s871_s8 = smov 8  }
 0x169   : > { %680 = dma.vmem_to_hbm [thread:$0]  (%p986_p12), %s1095_s4, 2048, %s1093_s16, %s423_s11, %s870_s20, %s870_s20, %s871_s8  }
 0x16a PF: > { %s451_s9 = sand.u32 1, %s851_s12   ;;  %p1161_p10 = scmp.ne.s32.totalorder %s1151_s19, 0 }
 0x16b   : > { %p1162_p13 = scmp.ge.s32.totalorder %s863_s15, 2  ;;  %s452_s25 = scalar_lea.sflag [#allocation4], %s451_s9 }
 0x16d   : > { %p691_p3 = pnand %p1162_p13, %p1161_p10 }
 0x16f   : > { %846 = dma.done.wait (!%p691_p3), %s452_s25, 2048  }
 0x170   : > { %848 = vsyncadd (!%p691_p3), %s452_s25, 4294965248  ;;  %p17_p7 = scmp.ge.s32.totalorder %s948_s24, 4   ;;  %s1163_s12 = smov %s855_s13 }
 0x171   : > { %s1164_s13 = smov %s859_s14  ;;  %s1165_s14 = smov %s982_s17 }
 0x172   : > { %s1166_s15 = smov %s948_s24  ;;  %19 = sbr.rel (!%p17_p7) target bundleno = 6 (0x6), region = 81 }
 0x179   :  { %457 = vsyncpa [#allocation3], 1 }
 0x17a   :  { %459 = vsyncpa [#allocation3 + $0x1], 1 }
 0x17b   :  { %460 = vsyncpa [#allocation6], 1 }
 0x17c   :  { %461 = vsyncpa [#allocation4], 1 }
 0x17d   :  { %463 = vsyncpa [#allocation4 + $0x1], 1 }

</bundles_post_ra>
